<compile_context>
chip_gen: v7x
topology: tpu7x:2x2x1
jax: 0.10.0
libtpu: 0.0.40
codegen_flags: <defaults>
</compile_context>

<pallas_src>
import functools
import math

import jax
import jax.numpy as jnp
from jax.experimental import pallas as pl
from jax.experimental.pallas import tpu as pltpu


def _round_up(v, m):
    return -(-v // m) * m


_VMEM_LIMIT = 32 * 1024 * 1024          # explicit: v5e scoped default is 16 MiB
_FUSED_VMEM_BUDGET = 20 * 1024 * 1024   # headroom under the 32 MiB scope


# --------------------------------------------------------------------------- #
# Path 1: fused kn2row conv (stride == 1) -- no HBM im2col, no transposes     #
# --------------------------------------------------------------------------- #
def _fused_conv_kernel(x_ref, w_ref, b_ref, o_ref, acc_ref, *, kk, kw, wp, r):
    """One (sample, C_out tile).
    x_ref : (C_in, HP*WP)      bf16 flattened padded image
    w_ref : (KH*KW, tcout, C_in) bf16, already scaled by 1/sqrt(C_in)
    b_ref : (tcout, 1)         f32, already scaled
    o_ref : (tcout, OH*WP)     output in flat padded coords (garbage cols sliced
                               off on the host; reshape there is a free bitcast)
    acc_ref: (tcout, OH*WP)    f32 scratch accumulator
    """
    acc_ref[...] = jnp.broadcast_to(b_ref[...], acc_ref.shape)
    for t in range(kk):                       # static unroll over kernel taps
        dy, dx = divmod(t, kw)
        off = dy * wp + dx                    # static shift in flat padded coords
        acc_ref[...] += jnp.dot(w_ref[t], x_ref[:, off:off + r],
                                preferred_element_type=jnp.float32)
    o_ref[...] = acc_ref[...].astype(o_ref.dtype)


def _plan_fused_tcout(c_in, c_out_p, kk, hpw, r, out_bytes):
    """Pick the largest C_out tile (<=256) whose double-buffered working set
    fits the VMEM budget; None -> use the fallback path."""
    cands = []
    for c in (min(c_out_p, 256), 256, 128, 64, 32, 16, 8):
        if c <= 256 and c_out_p % c == 0 and c not in cands:
            cands.append(c)
    for tcout in cands:
        est = (2 * c_in * hpw * 2            # x block (bf16, double buffered)
               + 2 * kk * tcout * c_in * 2   # weight block
               + tcout * r * 4               # f32 accumulator scratch
               + 2 * tcout * r * out_bytes   # output block
               + 2 * tcout * 4)              # bias
        if est <= _FUSED_VMEM_BUDGET:
            return tcout
    return None


def _std_conv2d_fused(x, weight, bias, padding, scale, tcout, compute_dtype):
    n, c_in, h, w = x.shape
    c_out, _, kh, kw = weight.shape
    hp, wp = h + 2 * padding, w + 2 * padding
    oh, ow = hp - kh + 1, wp - kw + 1
    c_out_p = _round_up(c_out, 8)
    extra = 1 if kw > 1 else 0               # spare bottom row: every tap's
    hpw = (hp + extra) * wp                  # shifted window stays in bounds
    r = oh * wp                              # acc width in flat *padded* coords

    # Host prep: bf16 cast BEFORE the (small, halo-only) pad; fold scale+bias;
    # the reshape to flat coords is a free minor-dim collapse.
    xp = jnp.pad(x.astype(compute_dtype),
                 ((0, 0), (0, 0), (padding, padding + extra), (padding, padding)))
    x_flat = xp.reshape(n, c_in, hpw)
    w_k = (jnp.transpose(weight, (2, 3, 0, 1)).reshape(kh * kw, c_out, c_in)
           * scale)
    b_col = (bias * scale).astype(jnp.float32).reshape(c_out, 1)
    if c_out_p != c_out:
        w_k = jnp.pad(w_k, ((0, 0), (0, c_out_p - c_out), (0, 0)))
        b_col = jnp.pad(b_col, ((0, c_out_p - c_out), (0, 0)))
    w_k = w_k.astype(compute_dtype)

    grid = (n, c_out_p // tcout)             # both parallel; >=2 tiles keeps both
                                             # v7x TensorCores busy for batches
    kernel = functools.partial(_fused_conv_kernel,
                               kk=kh * kw, kw=kw, wp=wp, r=r)
    out = pl.pallas_call(
        kernel,
        out_shape=jax.ShapeDtypeStruct((n, c_out_p, r), x.dtype),
        grid_spec=pltpu.PrefetchScalarGridSpec(
            num_scalar_prefetch=0,
            grid=grid,
            in_specs=[
                # x block index ignores j -> DMA'd once per sample (j is inner)
                pl.BlockSpec((None, c_in, hpw), lambda i, j: (i, 0, 0)),
                pl.BlockSpec((kh * kw, tcout, c_in), lambda i, j: (0, j, 0)),
                pl.BlockSpec((tcout, 1), lambda i, j: (j, 0)),
            ],
            out_specs=pl.BlockSpec((None, tcout, r), lambda i, j: (i, j, 0)),
            scratch_shapes=[pltpu.VMEM((tcout, r), jnp.float32)],
        ),
        compiler_params=pltpu.CompilerParams(
            dimension_semantics=("parallel", "parallel"),
            vmem_limit_bytes=_VMEM_LIMIT),
    )(x_flat, w_k, b_col)

    # Drop padded-width garbage columns / C_out padding.  The reshape is a free
    # bitcast; the slice is the only host copy and is a no-op for 1x1 convs.
    return out.reshape(n, c_out_p, oh, wp)[:, :c_out, :, :ow]


# --------------------------------------------------------------------------- #
# Path 2: fallback -- host im2col + tiled MXU matmul (stride>1 / huge images) #
# --------------------------------------------------------------------------- #
def _mm_kernel(a_ref, w_ref, b_ref, o_ref, acc_ref):
    k = pl.program_id(2)

    @pl.when(k == 0)
    def _init():
        acc_ref[...] = jnp.zeros_like(acc_ref)

    acc_ref[...] += jnp.dot(a_ref[...], w_ref[...],
                            preferred_element_type=jnp.float32)

    @pl.when(k == pl.num_programs(2) - 1)
    def _fin():
        o_ref[...] = (acc_ref[...] + b_ref[...]).astype(o_ref.dtype)


def _im2col_nchw(x, kh, kw, stride, padding):
    """(N,C,H,W) -> (N*OH*OW, C*KH*KW), K ordered (C, KH, KW) to match
    weight.reshape(C_out, C_in*KH*KW)."""
    n, c, h, w = x.shape
    if padding:
        x = jnp.pad(x, ((0, 0), (0, 0), (padding, padding), (padding, padding)))
    hp, wp = x.shape[2], x.shape[3]
    oh = (hp - kh) // stride + 1
    ow = (wp - kw) // stride + 1
    cols = []
    for i in range(kh):
        for j in range(kw):
            cols.append(x[:, :, i:i + stride * (oh - 1) + 1:stride,
                               j:j + stride * (ow - 1) + 1:stride])
    patches = jnp.stack(cols, axis=2)                   # (N, C, KH*KW, OH, OW)
    patches = jnp.transpose(patches, (0, 3, 4, 1, 2))   # (N, OH, OW, C, KH*KW)
    return patches.reshape(n * oh * ow, c * kh * kw), oh, ow


def _std_conv2d_im2col(x, weight, bias, stride, padding, scale, compute_dtype,
                       tm=1024, tk_max=512):
    n, c_in, h, w = x.shape
    c_out, _, kh, kw = weight.shape

    # Cast BEFORE im2col so the KH*KW-duplicated patch matrix is written once,
    # in bf16 (halves the dominant host-side HBM stream).
    a, oh, ow = _im2col_nchw(x.astype(compute_dtype), kh, kw, stride, padding)
    m, k = a.shape
    w_mat = (weight.reshape(c_out, k).T * scale).astype(compute_dtype)
    b_vec = (bias * scale).astype(jnp.float32)

    tn = 256 if c_out > 128 else 128          # 256 fills the v6e/v7x MXU width
    cout_p = _round_up(c_out, tn)
    if k <= tk_max:
        tk, k_p = k, k
    else:
        tk = tk_max
        k_p = _round_up(k, tk)
    tm = min(tm, _round_up(m, 8))
    m_p = _round_up(m, tm)
    # TODO(synk): mask the ragged last M tile in-kernel instead of jnp.pad-ing
    # the im2col matrix (extra HBM pass whenever m % tm != 0).
    if (m_p, k_p) != (m, k):
        a = jnp.pad(a, ((0, m_p - m), (0, k_p - k)))
    if (k_p, cout_p) != (k, c_out):
        w_mat = jnp.pad(w_mat, ((0, k_p - k), (0, cout_p - c_out)))
    if cout_p != c_out:
        b_vec = jnp.pad(b_vec, (0, cout_p - c_out))
    b_mat = b_vec.reshape(1, cout_p)

    grid = (m_p // tm, cout_p // tn, k_p // tk)        # reduction axis last
    out = pl.pallas_call(
        _mm_kernel,
        out_shape=jax.ShapeDtypeStruct((m_p, cout_p), x.dtype),
        grid_spec=pltpu.PrefetchScalarGridSpec(
            num_scalar_prefetch=0,
            grid=grid,
            in_specs=[
                pl.BlockSpec((tm, tk), lambda i, j, kk: (i, kk)),
                pl.BlockSpec((tk, tn), lambda i, j, kk: (kk, j)),
                pl.BlockSpec((1, tn), lambda i, j, kk: (0, j)),
            ],
            out_specs=pl.BlockSpec((tm, tn), lambda i, j, kk: (i, j)),
            scratch_shapes=[pltpu.VMEM((tm, tn), jnp.float32)],
        ),
        compiler_params=pltpu.CompilerParams(
            dimension_semantics=("parallel", "parallel", "arbitrary"),
            vmem_limit_bytes=_VMEM_LIMIT),
    )(a, w_mat, b_mat)

    out = out[:m, :c_out].reshape(n, oh, ow, c_out)
    return jnp.transpose(out, (0, 3, 1, 2))


# --------------------------------------------------------------------------- #
# Public entry point                                                          #
# --------------------------------------------------------------------------- #
def std_conv2d(x, weight, bias=None, *, stride=1, padding=0,
               compute_dtype=jnp.bfloat16):
    """Forward of StdConv2d: conv2d(x, weight, bias) / sqrt(C_in).

    x: (N, C_in, H, W); weight: (C_out, C_in, KH, KW); bias: (C_out,) or None.
    compute_dtype is the MXU feed dtype (f32 accumulation is always used).
    """
    n, c_in, h, w = x.shape
    c_out, _, kh, kw = weight.shape
    if bias is None:
        bias = jnp.zeros((c_out,), jnp.float32)
    scale = 1.0 / math.sqrt(c_in)             # == 1/sqrt(x.shape[-3]) in module

    if stride == 1:
        hp, wp = h + 2 * padding, w + 2 * padding
        oh, ow = hp - kh + 1, wp - kw + 1
        if oh > 0 and ow > 0:
            extra = 1 if kw > 1 else 0
            hpw = (hp + extra) * wp
            c_out_p = _round_up(c_out, 8)
            tcout = _plan_fused_tcout(c_in, c_out_p, kh * kw, hpw, oh * wp,
                                      x.dtype.itemsize)
            if tcout is not None:
                return _std_conv2d_fused(x, weight, bias, padding, scale,
                                         tcout, compute_dtype)
    # TODO(synk): extend the fused kn2row kernel to strided convs (strided lane
    # slice of the padded row) instead of falling back to host-side im2col.
    return _std_conv2d_im2col(x, weight, bias, stride, padding, scale,
                              compute_dtype)


def _ref_std_conv2d(x, weight, bias, stride, padding):
    y = jax.lax.conv_general_dilated(
        x, weight, (stride, stride),
        [(padding, padding), (padding, padding)],
        dimension_numbers=("NCHW", "OIHW", "NCHW"),
        precision=jax.lax.Precision.HIGHEST)
    return (y + bias[None, :, None, None]) / math.sqrt(x.shape[1])


if __name__ == "__main__":
    key = jax.random.PRNGKey(0)
    kx, kw1, kw3 = jax.random.split(key, 3)

    # Shapes consistent with the module: StdConv2d(in_channels=4, out_channels=8)
    N, C_in, H, W = 2, 4, 16, 16
    C_out = 8

    x = jax.random.normal(kx, (N, C_in, H, W), dtype=jnp.float32)
    bias = jnp.zeros((C_out,), dtype=jnp.float32)           # zeros init

    # --- test 1: default 1x1 kernel, stride=1, padding=0 (fused path) -------
    w1 = jax.random.normal(kw1, (C_out, C_in, 1, 1), dtype=jnp.float32)
    y1 = jax.block_until_ready(std_conv2d(x, w1, bias, stride=1, padding=0))
    r1 = _ref_std_conv2d(x, w1, bias, 1, 0)
    assert y1.shape == (N, C_out, H, W)
    assert jnp.allclose(y1, r1, atol=5e-2, rtol=5e-2)        # bf16-feed tolerance

    # --- test 2: 3x3 kernel, padding=1 (fused kn2row tap accumulation) ------
    w3 = jax.random.normal(kw3, (C_out, C_in, 3, 3), dtype=jnp.float32)
    y3 = jax.block_until_ready(std_conv2d(x, w3, bias, stride=1, padding=1))
    r3 = _ref_std_conv2d(x, w3, bias, 1, 1)
    assert y3.shape == (N, C_out, H, W)
    assert jnp.allclose(y3, r3, atol=1e-1, rtol=5e-2)

    # --- test 3: 3x3 stride=2, padding=1 (fallback im2col matmul path) ------
    y2 = jax.block_until_ready(std_conv2d(x, w3, bias, stride=2, padding=1))
    r2 = _ref_std_conv2d(x, w3, bias, 2, 1)
    assert y2.shape == (N, C_out, 8, 8)
    assert jnp.allclose(y2, r2, atol=1e-1, rtol=5e-2)

    print("KERNEL_OK")
</pallas_src>

<mosaic_0001>
module attributes {stable_mosaic.version = 11 : i64} {
  func.func @_fused_conv_kernel(%arg0: i32, %arg1: i32, %arg2: memref<1x4x256xbf16, #tpu.memory_space<vmem>>, %arg3: memref<1x8x4xbf16, #tpu.memory_space<vmem>>, %arg4: memref<8x1xf32, #tpu.memory_space<vmem>>, %arg5: memref<1x8x256xf32, #tpu.memory_space<vmem>>, %arg6: memref<8x256xf32, #tpu.memory_space<vmem>>) attributes {dimension_semantics = [#tpu.dimension_semantics<parallel>, #tpu.dimension_semantics<parallel>], iteration_bounds = array<i64: 2, 1>, scalar_prefetch = 0 : i64, scratch_operands = 1 : i64, tpu.core_type = #tpu.core_type<tc>, window_params = [{transform_indices = @transform_0, window_bounds = array<i64: 1, 4, 256>}, {transform_indices = @transform_1, window_bounds = array<i64: 1, 8, 4>}, {transform_indices = @transform_2, window_bounds = array<i64: 8, 1>}, {transform_indices = @transform_3, window_bounds = array<i64: 1, 8, 256>}]} {
    %c0 = arith.constant 0 : index
    %c0_0 = arith.constant 0 : index
    %0 = vector.load %arg4[%c0, %c0_0] : memref<8x1xf32, #tpu.memory_space<vmem>>, vector<8x1xf32>
    %1 = vector.shape_cast %0 : vector<8x1xf32> to vector<8x1xf32>
    %2 = vector.broadcast %1 : vector<8x1xf32> to vector<8x256xf32>
    %c0_1 = arith.constant 0 : index
    %c0_2 = arith.constant 0 : index
    %3 = vector.load %arg6[%c0_1, %c0_2] : memref<8x256xf32, #tpu.memory_space<vmem>>, vector<8x256xf32>
    tpu.vector_store %arg6[%c0_1, %c0_2], %2 {strides = array<i32>} : memref<8x256xf32, #tpu.memory_space<vmem>>, vector<8x256xf32>,
    %c0_3 = arith.constant 0 : index
    %c0_4 = arith.constant 0 : index
    %4 = vector.load %arg6[%c0_3, %c0_4] : memref<8x256xf32, #tpu.memory_space<vmem>>, vector<8x256xf32>
    %c0_5 = arith.constant 0 : index
    %c0_6 = arith.constant 0 : index
    %c0_7 = arith.constant 0 : index
    %5 = vector.load %arg3[%c0_5, %c0_6, %c0_7] : memref<1x8x4xbf16, #tpu.memory_space<vmem>>, vector<1x8x4xbf16>
    %6 = vector.shape_cast %5 : vector<1x8x4xbf16> to vector<8x4xbf16>
    %c0_8 = arith.constant 0 : index
    %c0_9 = arith.constant 0 : index
    %c0_10 = arith.constant 0 : index
    %7 = vector.load %arg2[%c0_8, %c0_9, %c0_10] : memref<1x4x256xbf16, #tpu.memory_space<vmem>>, vector<1x4x256xbf16>
    %8 = vector.shape_cast %7 : vector<1x4x256xbf16> to vector<4x256xbf16>
    %cst = arith.constant dense<0.000000e+00> : vector<8x256xf32>
    %9 = tpu.matmul %6, %8, %cst {dimension_numbers = #tpu.dot_dimension_numbers<[1], [0], [0], [1], [0, 0, 1, 1], [], []>} : vector<8x4xbf16>, vector<4x256xbf16>, vector<8x256xf32> -> vector<8x256xf32>
    %10 = arith.addf %4, %9 : vector<8x256xf32>
    %c0_11 = arith.constant 0 : index
    %c0_12 = arith.constant 0 : index
    %11 = vector.load %arg6[%c0_11, %c0_12] : memref<8x256xf32, #tpu.memory_space<vmem>>, vector<8x256xf32>
    tpu.vector_store %arg6[%c0_11, %c0_12], %10 {strides = array<i32>} : memref<8x256xf32, #tpu.memory_space<vmem>>, vector<8x256xf32>,
    %c0_13 = arith.constant 0 : index
    %c0_14 = arith.constant 0 : index
    %12 = vector.load %arg6[%c0_13, %c0_14] : memref<8x256xf32, #tpu.memory_space<vmem>>, vector<8x256xf32>
    %c0_15 = arith.constant 0 : index
    %c0_16 = arith.constant 0 : index
    %c0_17 = arith.constant 0 : index
    %13 = vector.load %arg5[%c0_15, %c0_16, %c0_17] : memref<1x8x256xf32, #tpu.memory_space<vmem>>, vector<1x8x256xf32>
    %14 = vector.shape_cast %13 : vector<1x8x256xf32> to vector<8x256xf32>
    %15 = vector.shape_cast %12 : vector<8x256xf32> to vector<1x8x256xf32>
    tpu.vector_store %arg5[%c0_15, %c0_16, %c0_17], %15 {strides = array<i32>} : memref<1x8x256xf32, #tpu.memory_space<vmem>>, vector<1x8x256xf32>,
    return
  }
  func.func @transform_0(%arg0: i32, %arg1: i32) -> (i32, i32, i32) {
    %c0_i32 = arith.constant 0 : i32
    %c0_i32_0 = arith.constant 0 : i32
    %c0_i32_1 = arith.constant 0 : i32
    return %arg0, %c0_i32, %c0_i32_0 : i32, i32, i32
  }
  func.func @transform_1(%arg0: i32, %arg1: i32) -> (i32, i32, i32) {
    %c0_i32 = arith.constant 0 : i32
    %c0_i32_0 = arith.constant 0 : i32
    %c0_i32_1 = arith.constant 0 : i32
    return %c0_i32, %arg1, %c0_i32_0 : i32, i32, i32
  }
  func.func @transform_2(%arg0: i32, %arg1: i32) -> (i32, i32) {
    %c0_i32 = arith.constant 0 : i32
    %c0_i32_0 = arith.constant 0 : i32
    return %arg1, %c0_i32 : i32, i32
  }
  func.func @transform_3(%arg0: i32, %arg1: i32) -> (i32, i32, i32) {
    %c0_i32 = arith.constant 0 : i32
    %c0_i32_0 = arith.constant 0 : i32
    return %arg0, %arg1, %c0_i32 : i32, i32, i32
  }
}

</mosaic_0001>

<bundles_post_ra>
// kernel: tpu_custom_call.1
= control target key start
LH: loop header
LB: loop body
LE: loop exit
PB: predicated region body
PF: predicated region fallthrough
CT: control target
= control target key end

     0   :  { %8 = vsyncpa [#allocation4], 0  ;;  %s713_s0 = inlined_call_operand.vmem [shape: bf16[2,4,256], index: 0, kind: input, shape index: {}]   ;;  %s714_s1 = inlined_call_operand.vmem [shape: bf16[1,8,4], index: 1, kind: input, shape index: {}]   ;;  %s715_s2 = inlined_call_operand.vmem [shape: f32[8,1], index: 2, kind: input, shape index: {}]   ;;  %s716_s3 = inlined_call_operand.hbm [shape: f32[2,8,256], index: 3, kind: output, shape index: {}]  }
   0x1   :  { %10 = vsyncpa [#allocation4 + $0x1], 0  ;;  %s595_s12 = smov 0   ;;  %s597_s13 = smov 0  }
   0x2   :  { %s599_s14 = smov 0   ;;  %s601_s15 = smov 0  }
   0x3   :  { %s603_s16 = smov 0   ;;  %s605_s17 = smov 0  }
   0x4 LB: > { %s416_s18 = sadd.s32 4294967295, %s571_s17   ;;  %s417_s19 = sadd.s32 4294967294, %s571_s17   ;;  %s571_s17 = sphi %s605_s17, %s16_s17   ;;  %s567_s16 = sphi %s603_s16, %s723_s16   ;;  %s563_s15 = sphi %s601_s15, %s722_s15   ;;  %s559_s14 = sphi %s599_s14, %s721_s14   ;;  %s555_s13 = sphi %s597_s13, %s720_s13   ;;  %s551_s12 = sphi %s595_s12, %s719_s12  }
   0x5   : > { %s28_s20 = sadd.s32 1, %s567_s16  ;;  %s115_s21 = sadd.s32 1, %s559_s14 }
   0x6   : > { %p30_p0 = scmp.ge.s32.totalorder %s28_s20, 2  ;;  %p125_p1 = scmp.ne.s32.totalorder %s559_s14, %s555_s13 }
   0x7   : > { %p126_p2 = scmp.eq.s32.totalorder %s416_s18, 1  ;;  %p131_p3 = scmp.ne.s32.totalorder %s555_s13, %s551_s12 }
   0x8   : > { %s725_s20 = smov (%p30_p0, %s28_s20), 0  ;;  %p132_p5 = scmp.eq.s32.totalorder %s417_s19, 1 }
   0x9   : > { %p635_p4 = por %p126_p2, %p125_p1  ;;  %s110_s23 = ssub.s32 %s567_s16, %s725_s20 }
   0xa   : > { %p422_p6 = scmp.ge.s32.totalorder %s571_s17, 1  ;;  %p113_p7 = scmp.eq.s32.totalorder %s110_s23, 0 }
   0xb   : > { %p642_p8 = por %p132_p5, %p131_p3  ;;  %p172_p9 = scmp.lt.s32.totalorder %s571_s17, 3 }
   0xc   : > { %s648_s25 = scalar_select %p113_p7, %s559_s14, %s115_s21  }
   0xd   : > { %p173_p10 = pnand %p422_p6, %p172_p9 }
   0xe   : > { %p204_p11 = scmp.lt.s32.totalorder (!%p173_p10), %s563_s15, 1  ;;  %v573_v0 = vmov (!%p173_p10), 0   ;;  %v218_v1 = vld [vmem:[%s715_s2] sm:$0xff] (!%p173_p10)  ;;  %vm243_vm0 = vcmask (!%p173_p10), 1041408   ;;  %vm239_vm1 = vcmask (!%p173_p10), 31744   ;;  %s201_s8 = sand.u32 (!%p173_p10), 1, %s555_s13  }
   0xf   : > { %176 = sbr.rel (%p173_p10) target bundleno = 262 (0x106), region = 32  ;;  %282 = vmatprep.mubr.bf16.mxu0 (!%p173_p10), %v573_v0  ;;  %492 = vset.pattern.permute.xlu0 (!%p173_p10), %v573_v0  ;;  %v228_v5 = vld [vmem:[%s714_s1] sm:$0xf] (!%p173_p10)  ;;  %s423_s9 = sshll.u32 (!%p173_p10), %s201_s8, 4 }
  0x10   : > { %221 = vperm.xlu0 (!%p173_p10), %492, %v218_v1   ;;  %s435_s10 = sshll.u32 (!%p173_p10), %s563_s15, 8  ;;  %s203_s11 = scalar_lea.vmem (!%p173_p10), [#allocation3], %s423_s9 }
  0x11   : > { %s316_s18 = sshll.u32 (!%p173_p10), %s203_s11, 4  ;;  %s666_s23 = scalar_lea.hbm (!%p173_p10), %s716_s3, %s435_s10  ;;  %s668_s18 = int_to_ptr.vmem [resolvable:$true] %s316_s18 }
  0x12   : > { %s493_s26 = scalar_lea.vmem (!%p173_p10), %s668_s18, 256  ;;  %s574_s27 = smov (!%p173_p10), [#allocation3]  }
  0x13   : > { %p494_p12 = scmp.ne.s32.totalorder (!%p173_p10), %s668_s18, %s493_s26 }
  0x15   : > { %p495_p13 = pnand (!%p173_p10), %p494_p12, %p635_p4 }
  0x16   : > { %s205_s28 = scalar_select %p204_p11, %s563_s15, 1 }
  0x17   : > { %s300_s15 = scalar_lea.sflag [#allocation4], %s201_s8  ;;  %p496_p0 = pneg %p495_p13 }
  0x18   : > { %s434_s29 = sshll.u32 %s205_s28, 2  ;;  %s497_s28 = sshll.u32 %s574_s27, 4  ;;  %s498_s28 = int_to_ptr.vmem [resolvable:$false] %s497_s28 }
  0x19   : > { %s208_s5 = scalar_lea.vmem %s713_s0, %s434_s29  ;;  %s499_s29 = scalar_lea.vmem %s498_s28, 512 }
  0x1a   : > { %v426_v2 = vld.sshfl [vmem:[%s208_s5] sm:$0x33 pattern:$0x76325410]  ;;  %p500_p1 = scmp.lt.s32.totalorder %s668_s18, %s498_s28  ;;  %p501_p2 = scmp.lt.s32.totalorder %s499_s29, %s493_s26 }
  0x1b   : > { %v238_v3 = vcombine.high %v426_v2, %v426_v2  ;;  %v245_v4 = vsel %vm243_vm0, %v426_v2, 0 }
  0x1c   : > { %p502_p3 = por %p501_p2, %p500_p1 }
  0x1d   : > { %427 = vmatprep.subr.msk.bf16.mxu0 %vm243_vm0, %v238_v3 }
  0x1e   : > { %251 = vmatpush1.bf16.msra.mxu0 %v245_v4  ;;  %p503_p5 = pnand %p502_p3, %p496_p0 }
  0x21   : > { %428 = vmatmul.mubr.msk.bf16.vlgmr.msra.gmra.mrb[0].mxu0 %vm239_vm1, %v228_v5 }
  0x8f   : > { %v222_v6 = vpop.permute.xlu0 %221 }
  0xf4   : > { %v284_v7 = vpop.f32.mrb[0].mxu0 }
  0xf5   : > { %v291_v8 = vadd.f32 %v284_v7, %v222_v6  ;;  %v286_v9 = vpop.f32.mrb[1].mxu0 }
  0xf6   : > { %v292_v10 = vadd.f32 %v286_v9, %v222_v6  ;;  %v288_v11 = vpop.f32.mrb[2].mxu0 }
  0xf7   : > { %297 = vst [vmem:[%s203_s11] sm:$0xff] %v291_v8  ;;  %v289_v12 = vpop.f32.mrb[3].mxu0 }
  0xf8   : > { %298 = vst [vmem:[%s203_s11 + $0x8] sm:$0xff] %v292_v10 }
  0xf9   : > { %506 = shalt.err (!%p503_p5)
}
  0xfa   : > { %s507_s30 = scalar_lea.hbm %s666_s23, 256  ;;  %s511_s6 = scalar_lea.hbm %s716_s3, 512 }
  0xfb   : > { %p508_p6 = scmp.ne.s32.totalorder %s666_s23, %s507_s30  ;;  %p512_p10 = scmp.lt.u32.totalorder %s666_s23, %s716_s3 }
  0xfc   : > { %p513_p11 = scmp.lt.u32.totalorder %s511_s6, %s507_s30  ;;  %p515_p13 = scmp.lt.u32.totalorder %s507_s30, %s666_s23 }
  0xfd   : > { %p509_p7 = pnand %p508_p6, %p635_p4 }
  0xfe   : > { %p514_p12 = por %p513_p11, %p512_p10 }
  0xff   : > { %p510_p9 = pneg %p509_p7 }
 0x100   : > { %p516_p0 = por %p515_p13, %p514_p12 }
 0x102   : > { %p517_p1 = pnand %p516_p0, %p510_p9 }
 0x104   : > { %520 = shalt.err (!%p517_p1)
}
 0x105   : > { %436 = dma.vmem_to_hbm [thread:$0]  (%p635_p4), %s668_s18, 256, %s666_s23, %s300_s15  }
 0x106 PF: > { %p442_p2 = scmp.ge.s32.totalorder %s571_s17, 2  ;;  %s328_s9 = sand.u32 1, %s551_s12  }
 0x107   : > { %s329_s10 = scalar_lea.sflag [#allocation4], %s328_s9 }
 0x108   : > { %p439_p3 = pnand %p442_p2, %p642_p8 }
 0x10a   : > { %546 = dma.done.wait (!%p439_p3), %s329_s10, 256  }
 0x10b   : > { %548 = vsyncadd (!%p439_p3), %s329_s10, 4294967040  ;;  %s16_s17 = sadd.s32 1, %s571_s17   ;;  %s719_s12 = smov %s555_s13 }
 0x10c   : > { %p13_p5 = scmp.ge.s32.totalorder %s16_s17, 4   ;;  %s720_s13 = smov %s559_s14 }
 0x10d   : > { %s721_s14 = smov %s648_s25  ;;  %s722_s15 = smov %s567_s16 }
 0x10e   : > { %s723_s16 = smov %s725_s20  ;;  %15 = sbr.rel (!%p13_p5) target bundleno = 4 (0x4), region = 73 }
 0x115   :  { %334 = vsyncpa [#allocation4], 1 }
 0x116   :  { %336 = vsyncpa [#allocation4 + $0x1], 1 }

</bundles_post_ra>
